<compile_context>
chip_gen: v7x
topology: tpu7x:2x2x1
jax: 0.10.0
libtpu: 0.0.40
codegen_flags: <defaults>
</compile_context>

<pallas_src>
import jax
import jax.numpy as jnp
from jax.experimental import pallas as pl
from jax.experimental.pallas import tpu as pltpu

LANE = 128      # lane width: last-dim padding granularity
SUBLANE = 8     # sublane width: batch padding granularity


def _round_up(n, m):
    return ((n + m - 1) // m) * m


def _ffn_kernel(x_ref, w1_ref, b1_ref, w2_ref, b2_ref, o_ref):
    # fc1: (TB, D_in_p)bf16 @ (D_in_p, H_p)bf16 -> f32 accumulation on MXU
    h = jnp.dot(x_ref[...], w1_ref[...], preferred_element_type=jnp.float32)
    # bias + sigmoid in f32 (VPU + EUP slots, free next to the MXU)
    h = jax.nn.sigmoid(h + b1_ref[...])
    # fc2: cast activations back to bf16 for the second MXU pass, accumulate f32
    out = jnp.dot(h.astype(w2_ref.dtype), w2_ref[...],
                  preferred_element_type=jnp.float32)
    out = out + b2_ref[...]
    o_ref[...] = out.astype(o_ref.dtype)


def ffn_forward(x, w1, b1, w2, b2, *, tb_max=512):
    """Fused Linear->Sigmoid->Linear forward.

    x : (B, D_in) float32
    w1: (H, D_in), b1: (H,)        -- PyTorch fc1 layout
    w2: (D_out, H), b2: (D_out,)   -- PyTorch fc2 layout
    returns (B, D_out) in x.dtype
    """
    B, D_in = x.shape
    H = w1.shape[0]
    D_out = w2.shape[0]

    # Lane-dense padded feature dims (multiples of 128).
    d_in_p = _round_up(D_in, LANE)
    h_p = _round_up(H, LANE)
    d_out_p = _round_up(D_out, LANE)

    # Batch tiling: pad to sublane multiple, pick tile, pad to tile multiple.
    b_sub = _round_up(B, SUBLANE)
    tb = min(tb_max, b_sub)
    b_p = _round_up(b_sub, tb)
    grid = b_p // tb

    # bf16 MXU operands (zero padding), f32 biases.
    x_p = jnp.zeros((b_p, d_in_p), jnp.bfloat16)
    x_p = x_p.at[:B, :D_in].set(x.astype(jnp.bfloat16))
    w1_p = jnp.zeros((d_in_p, h_p), jnp.bfloat16)
    w1_p = w1_p.at[:D_in, :H].set(w1.T.astype(jnp.bfloat16))
    b1_p = jnp.zeros((1, h_p), jnp.float32)
    b1_p = b1_p.at[0, :H].set(b1.astype(jnp.float32))
    w2_p = jnp.zeros((h_p, d_out_p), jnp.bfloat16)
    w2_p = w2_p.at[:H, :D_out].set(w2.T.astype(jnp.bfloat16))
    b2_p = jnp.zeros((1, d_out_p), jnp.float32)
    b2_p = b2_p.at[0, :D_out].set(b2.astype(jnp.float32))

    out_p = pl.pallas_call(
        _ffn_kernel,
        out_shape=jax.ShapeDtypeStruct((b_p, d_out_p), x.dtype),
        grid_spec=pltpu.PrefetchScalarGridSpec(
            num_scalar_prefetch=0,
            grid=(grid,),
            in_specs=[
                # Batch-tiled activations.
                pl.BlockSpec((tb, d_in_p), lambda i: (i, 0)),
                # Weights / biases: constant index map -> VMEM-resident.
                pl.BlockSpec((d_in_p, h_p), lambda i: (0, 0)),
                pl.BlockSpec((1, h_p), lambda i: (0, 0)),
                pl.BlockSpec((h_p, d_out_p), lambda i: (0, 0)),
                pl.BlockSpec((1, d_out_p), lambda i: (0, 0)),
            ],
            out_specs=pl.BlockSpec((tb, d_out_p), lambda i: (i, 0)),
        ),
        compiler_params=pltpu.CompilerParams(
            # Batch axis is independent -> shard across TCs on v7x.
            dimension_semantics=("parallel",)),
    )(x_p, w1_p, b1_p, w2_p, b2_p)

    # Strip batch / feature padding.
    return out_p[:B, :D_out]


def _init_linear(key, in_features, out_features):
    """Deterministic PyTorch-style init: U(-1/sqrt(in), 1/sqrt(in))."""
    k_w, k_b = jax.random.split(key)
    bound = 1.0 / jnp.sqrt(jnp.float32(in_features))
    w = jax.random.uniform(k_w, (out_features, in_features),
                           jnp.float32, -bound, bound)
    b = jax.random.uniform(k_b, (out_features,), jnp.float32, -bound, bound)
    return w, b


if __name__ == "__main__":
    input_dim, hidden_dim, output_dim = 16, 32, 8
    batch = 8

    key = jax.random.PRNGKey(0)
    k_x, k1, k2 = jax.random.split(key, 3)

    x = jax.random.normal(k_x, (batch, input_dim), jnp.float32)
    w1, b1 = _init_linear(k1, input_dim, hidden_dim)   # (H, D_in), (H,)
    w2, b2 = _init_linear(k2, hidden_dim, output_dim)  # (D_out, H), (D_out,)

    out = ffn_forward(x, w1, b1, w2, b2)
    out = jax.block_until_ready(out)

    # Full-precision reference (same math as the PyTorch forward).
    ref_f32 = jax.nn.sigmoid(x @ w1.T + b1) @ w2.T + b2

    # Reference matching the kernel's bf16 MXU inputs / f32 accumulation.
    xb = x.astype(jnp.bfloat16).astype(jnp.float32)
    w1b = w1.astype(jnp.bfloat16).astype(jnp.float32)
    w2b = w2.astype(jnp.bfloat16).astype(jnp.float32)
    hb = jax.nn.sigmoid(xb @ w1b.T + b1).astype(jnp.bfloat16).astype(jnp.float32)
    ref_bf16 = hb @ w2b.T + b2

    assert out.shape == (batch, output_dim)
    assert jnp.allclose(out, ref_bf16, atol=2e-3, rtol=2e-3), \
        "mismatch vs bf16-matched reference"
    assert jnp.allclose(out, ref_f32, atol=5e-2, rtol=5e-2), \
        "mismatch vs f32 reference"

    print("KERNEL_OK")
</pallas_src>

<mosaic_0001>
module attributes {stable_mosaic.version = 11 : i64} {
  func.func @_ffn_kernel(%arg0: i32, %arg1: memref<8x128xbf16, #tpu.memory_space<vmem>>, %arg2: memref<128x128xbf16, #tpu.memory_space<vmem>>, %arg3: memref<1x128xf32, #tpu.memory_space<vmem>>, %arg4: memref<128x128xbf16, #tpu.memory_space<vmem>>, %arg5: memref<1x128xf32, #tpu.memory_space<vmem>>, %arg6: memref<8x128xf32, #tpu.memory_space<vmem>>) attributes {dimension_semantics = [#tpu.dimension_semantics<parallel>], iteration_bounds = array<i64: 1>, scalar_prefetch = 0 : i64, scratch_operands = 0 : i64, tpu.core_type = #tpu.core_type<tc>, window_params = [{transform_indices = @transform_0, window_bounds = array<i64: 8, 128>}, {pipeline_mode = #tpu.pipeline_mode<synchronous>, transform_indices = @transform_1, window_bounds = array<i64: 128, 128>}, {pipeline_mode = #tpu.pipeline_mode<synchronous>, transform_indices = @transform_2, window_bounds = array<i64: 1, 128>}, {pipeline_mode = #tpu.pipeline_mode<synchronous>, transform_indices = @transform_3, window_bounds = array<i64: 128, 128>}, {pipeline_mode = #tpu.pipeline_mode<synchronous>, transform_indices = @transform_4, window_bounds = array<i64: 1, 128>}, {transform_indices = @transform_5, window_bounds = array<i64: 8, 128>}]} {
    %c0 = arith.constant 0 : index
    %c0_0 = arith.constant 0 : index
    %0 = vector.load %arg1[%c0, %c0_0] : memref<8x128xbf16, #tpu.memory_space<vmem>>, vector<8x128xbf16>
    %c0_1 = arith.constant 0 : index
    %c0_2 = arith.constant 0 : index
    %1 = vector.load %arg2[%c0_1, %c0_2] : memref<128x128xbf16, #tpu.memory_space<vmem>>, vector<128x128xbf16>
    %cst = arith.constant dense<0.000000e+00> : vector<8x128xf32>
    %2 = tpu.matmul %0, %1, %cst {dimension_numbers = #tpu.dot_dimension_numbers<[1], [0], [0], [1], [0, 0, 1, 1], [], []>} : vector<8x128xbf16>, vector<128x128xbf16>, vector<8x128xf32> -> vector<8x128xf32>
    %c0_3 = arith.constant 0 : index
    %c0_4 = arith.constant 0 : index
    %3 = vector.load %arg3[%c0_3, %c0_4] : memref<1x128xf32, #tpu.memory_space<vmem>>, vector<1x128xf32>
    %4 = vector.broadcast %3 : vector<1x128xf32> to vector<8x128xf32>
    %5 = arith.addf %2, %4 : vector<8x128xf32>
    %6 = arith.negf %5 : vector<8x128xf32>
    %7 = math.exp %6 : vector<8x128xf32>
    %cst_5 = arith.constant 1.000000e+00 : f32
    %8 = vector.broadcast %cst_5 : f32 to vector<8x128xf32>
    %9 = arith.addf %8, %7 : vector<8x128xf32>
    %10 = arith.divf %8, %9 : vector<8x128xf32>
    %11 = arith.truncf %10 : vector<8x128xf32> to vector<8x128xbf16>
    %c0_6 = arith.constant 0 : index
    %c0_7 = arith.constant 0 : index
    %12 = vector.load %arg4[%c0_6, %c0_7] : memref<128x128xbf16, #tpu.memory_space<vmem>>, vector<128x128xbf16>
    %cst_8 = arith.constant dense<0.000000e+00> : vector<8x128xf32>
    %13 = tpu.matmul %11, %12, %cst_8 {dimension_numbers = #tpu.dot_dimension_numbers<[1], [0], [0], [1], [0, 0, 1, 1], [], []>} : vector<8x128xbf16>, vector<128x128xbf16>, vector<8x128xf32> -> vector<8x128xf32>
    %c0_9 = arith.constant 0 : index
    %c0_10 = arith.constant 0 : index
    %14 = vector.load %arg5[%c0_9, %c0_10] : memref<1x128xf32, #tpu.memory_space<vmem>>, vector<1x128xf32>
    %15 = vector.broadcast %14 : vector<1x128xf32> to vector<8x128xf32>
    %16 = arith.addf %13, %15 : vector<8x128xf32>
    %c0_11 = arith.constant 0 : index
    %c0_12 = arith.constant 0 : index
    %17 = vector.load %arg6[%c0_11, %c0_12] : memref<8x128xf32, #tpu.memory_space<vmem>>, vector<8x128xf32>
    tpu.vector_store %arg6[%c0_11, %c0_12], %16 {strides = array<i32>} : memref<8x128xf32, #tpu.memory_space<vmem>>, vector<8x128xf32>,
    return
  }
  func.func @transform_0(%arg0: i32) -> (i32, i32) {
    %c0_i32 = arith.constant 0 : i32
    %c0_i32_0 = arith.constant 0 : i32
    return %arg0, %c0_i32 : i32, i32
  }
  func.func @transform_1(%arg0: i32) -> (i32, i32) {
    %c0_i32 = arith.constant 0 : i32
    %c0_i32_0 = arith.constant 0 : i32
    %c0_i32_1 = arith.constant 0 : i32
    return %c0_i32, %c0_i32_0 : i32, i32
  }
  func.func @transform_2(%arg0: i32) -> (i32, i32) {
    %c0_i32 = arith.constant 0 : i32
    %c0_i32_0 = arith.constant 0 : i32
    %c0_i32_1 = arith.constant 0 : i32
    return %c0_i32, %c0_i32_0 : i32, i32
  }
  func.func @transform_3(%arg0: i32) -> (i32, i32) {
    %c0_i32 = arith.constant 0 : i32
    %c0_i32_0 = arith.constant 0 : i32
    %c0_i32_1 = arith.constant 0 : i32
    return %c0_i32, %c0_i32_0 : i32, i32
  }
  func.func @transform_4(%arg0: i32) -> (i32, i32) {
    %c0_i32 = arith.constant 0 : i32
    %c0_i32_0 = arith.constant 0 : i32
    %c0_i32_1 = arith.constant 0 : i32
    return %c0_i32, %c0_i32_0 : i32, i32
  }
  func.func @transform_5(%arg0: i32) -> (i32, i32) {
    %c0_i32 = arith.constant 0 : i32
    %c0_i32_0 = arith.constant 0 : i32
    return %arg0, %c0_i32 : i32, i32
  }
}

</mosaic_0001>

<bundles_post_ra>
// kernel: tpu_custom_call.1
= control target key start
LH: loop header
LB: loop body
LE: loop exit
PB: predicated region body
PF: predicated region fallthrough
CT: control target
= control target key end

     0   :  { %10 = vsyncpa [#allocation3], 0  ;;  %s605_s0 = inlined_call_operand.hbm [shape: bf16[8,128], index: 0, kind: input, shape index: {}]   ;;  %s606_s1 = inlined_call_operand.hbm [shape: bf16[128,128], index: 1, kind: input, shape index: {}]   ;;  %s607_s2 = inlined_call_operand.vmem [shape: f32[1,128], index: 2, kind: input, shape index: {}]   ;;  %s608_s3 = inlined_call_operand.hbm [shape: bf16[128,128], index: 3, kind: input, shape index: {}]   ;;  %s609_s4 = inlined_call_operand.vmem [shape: f32[1,128], index: 4, kind: input, shape index: {}]   ;;  %s610_s5 = inlined_call_operand.hbm [shape: f32[8,128], index: 5, kind: output, shape index: {}]  }
   0x1   :  { %11 = vsyncpa [#allocation6], 0 }
   0x2   :  { %12 = vsyncpa [#allocation4], 0  ;;  %s507_s18 = smov [#allocation5]   ;;  %s413_s22 = scalar_lea.hbm %s606_s1, 1024 }
   0x3   :  { %s28_s19 = sshll.u32 %s507_s18, 4  ;;  %p414_p0 = scmp.ne.s32.totalorder %s606_s1, %s413_s22  ;;  %s29_s19 = int_to_ptr.vmem [resolvable:$true] %s28_s19 }
   0x4   :  { %p417_p1 = scmp.lt.u32.totalorder %s413_s22, %s606_s1 }
   0x6   :  { %p419_p2 = pnand %p417_p1, %p414_p0 }
   0x8   :  { %422 = shalt.err (!%p419_p2)
}
   0x9   :  { %s423_s27 = scalar_lea.vmem %s29_s19, 1024  ;;  %p428_p4 = scmp.lt.s32.totalorder %s29_s19, %s29_s19 }
   0xa   :  { %p424_p3 = scmp.ne.s32.totalorder %s29_s19, %s423_s27  ;;  %p429_p5 = scmp.lt.s32.totalorder %s423_s27, %s423_s27 }
   0xc   :  { %p430_p6 = por %p429_p5, %p428_p4 }
   0xe   :  { %p431_p7 = pnand %p430_p6, %p424_p3 }
  0x10   :  { %434 = shalt.err (!%p431_p7)
}
  0x11   :  { %s508_s28 = smov 64   ;;  %s509_s29 = smov 4  }
  0x12   :  { %34 = dma.hbm_to_vmem [thread:$0]  %s606_s1, 1024, %s29_s19, [#allocation6], %s508_s28, %s508_s28, %s509_s29  }
  0x13   :  { %s510_s7 = smov [#allocation2]   ;;  %s511_s9 = smov [#allocation7]  }
  0x14   :  { %s19_s8 = sshll.u32 %s510_s7, 4  ;;  %s42_s10 = sshll.u32 %s511_s9, 4  ;;  %s20_s8 = int_to_ptr.vmem [resolvable:$true] %s19_s8  ;;  %s43_s10 = int_to_ptr.vmem [resolvable:$true] %s42_s10 }
  0x15   :  { %s435_s13 = scalar_lea.hbm %s605_s0, 64 }
  0x16   :  { %p436_p8 = scmp.ne.s32.totalorder %s605_s0, %s435_s13  ;;  %p439_p9 = scmp.lt.u32.totalorder %s435_s13, %s605_s0 }
  0x18   :  { %p441_p10 = pnand %p439_p9, %p436_p8 }
  0x1a   :  { %444 = shalt.err (!%p441_p10)
}
  0x1b   :  { %s445_s1 = scalar_lea.vmem %s20_s8, 64  ;;  %p450_p12 = scmp.lt.s32.totalorder %s20_s8, %s20_s8 }
  0x1c   :  { %p446_p11 = scmp.ne.s32.totalorder %s20_s8, %s445_s1  ;;  %p451_p13 = scmp.lt.s32.totalorder %s445_s1, %s445_s1 }
  0x1e   :  { %p452_p0 = por %p451_p13, %p450_p12 }
  0x20   :  { %p453_p1 = pnand %p452_p0, %p446_p11 }
  0x22   :  { %456 = shalt.err (!%p453_p1)
}
  0x23   :  { %22 = dma.hbm_to_vmem [thread:$0]  %s605_s0, 64, %s20_s8, [#allocation3]  }
  0x24   :  { %s457_s22 = scalar_lea.hbm %s608_s3, 1024 }
  0x25   :  { %p458_p2 = scmp.ne.s32.totalorder %s608_s3, %s457_s22  ;;  %p461_p3 = scmp.lt.u32.totalorder %s457_s22, %s608_s3 }
  0x27   :  { %p463_p4 = pnand %p461_p3, %p458_p2 }
  0x29   :  { %466 = shalt.err (!%p463_p4)
}
  0x2a   :  { %s467_s27 = scalar_lea.vmem %s43_s10, 1024  ;;  %p472_p6 = scmp.lt.s32.totalorder %s43_s10, %s43_s10 }
  0x2b   :  { %p468_p5 = scmp.ne.s32.totalorder %s43_s10, %s467_s27  ;;  %p473_p7 = scmp.lt.s32.totalorder %s467_s27, %s467_s27 }
  0x2d   :  { %p474_p8 = por %p473_p7, %p472_p6 }
  0x2f   :  { %p475_p9 = pnand %p474_p8, %p468_p5 }
  0x31   :  { %478 = shalt.err (!%p475_p9)
}
  0x32   :  { %48 = dma.hbm_to_vmem [thread:$0]  %s608_s3, 1024, %s43_s10, [#allocation6], %s508_s28, %s508_s28, %s509_s29  }
  0x33   :  { %501 = dma.done.wait [#allocation3], 64  }
  0x34   :  { %502 = vsyncadd [#allocation3], 4294967232 }
  0x35   :  { %503 = dma.done.wait [#allocation6], 2048  }
  0x36   :  { %504 = vsyncadd [#allocation6], 4294965248  ;;  %v512_v0 = vmov 0.0   ;;  %vm513_vm0 = vmmov 0   ;;  %v393_v1 = vld [vmem:[#allocation5] sm:$0xff]   ;;  %v394_v2 = vld [vmem:[#allocation5 + $0x8] sm:$0xff]  }
  0x37   :  { %345 = vmatprep.subr.bf16.mxu0 %v512_v0  ;;  %361 = vmatprep.mubr.msk.bf16.mxu0 %vm513_vm0, %v512_v0  ;;  %v395_v3 = vld [vmem:[#allocation5 + $0x10] sm:$0xff]   ;;  %v396_v4 = vld [vmem:[#allocation5 + $0x18] sm:$0xff]   ;;  %v397_v5 = vld [vmem:[#allocation5 + $0x20] sm:$0xff]   ;;  %s514_s7 = smov [#allocation8]  }
  0x38   :  { %365 = vmatprep.subr.bf16.mxu1 %v512_v0  ;;  %381 = vmatprep.mubr.msk.bf16.mxu1 %vm513_vm0, %v512_v0  ;;  %v398_v6 = vld [vmem:[#allocation5 + $0x28] sm:$0xff]   ;;  %v399_v7 = vld [vmem:[#allocation5 + $0x30] sm:$0xff]   ;;  %v400_v8 = vld [vmem:[#allocation5 + $0x38] sm:$0xff]   ;;  %s298_s8 = sshll.u32 %s514_s7, 4  ;;  %s299_s8 = int_to_ptr.vmem [resolvable:$true] %s298_s8 }
  0x39   :  { %346 = vmatpush3.bf16.msra.mxu0 %v393_v1  ;;  %v61_v9 = vld [vmem:[#allocation2] sm:$0xf]  ;;  %v401_v10 = vld [vmem:[#allocation7] sm:$0xff]   ;;  %v402_v11 = vld [vmem:[#allocation7 + $0x8] sm:$0xff]   ;;  %p484_p11 = scmp.lt.s32.totalorder %s299_s8, %s299_s8 }
  0x3a   :  { %347 = vmatprep.subr.bf16.mxu0 %v512_v0  ;;  %366 = vmatpush3.bf16.msra.mxu1 %v401_v10  ;;  %v403_v12 = vld [vmem:[#allocation7 + $0x10] sm:$0xff]   ;;  %v404_v13 = vld [vmem:[#allocation7 + $0x18] sm:$0xff]   ;;  %v405_v14 = vld [vmem:[#allocation7 + $0x20] sm:$0xff]  }
  0x3b   :  { %367 = vmatprep.subr.bf16.mxu1 %v512_v0  ;;  %v406_v15 = vld [vmem:[#allocation7 + $0x28] sm:$0xff]   ;;  %v407_v16 = vld [vmem:[#allocation7 + $0x30] sm:$0xff]   ;;  %v408_v17 = vld [vmem:[#allocation7 + $0x38] sm:$0xff]  }
  0x3c   :  { %v308_v18 = vld [vmem:[%s607_s2] ss:$0 sm:$0xff]  ;;  %s479_s2 = scalar_lea.vmem %s299_s8, 128 }
  0x3d   :  { %348 = vmatpush3.bf16.msra.mxu0 %v394_v2  ;;  %v318_v29 = vld [vmem:[%s609_s4] ss:$0 sm:$0xff]  ;;  %p480_p10 = scmp.ne.s32.totalorder %s299_s8, %s479_s2  ;;  %p485_p12 = scmp.lt.s32.totalorder %s479_s2, %s479_s2 }
  0x3e   :  { %349 = vmatprep.subr.bf16.mxu0 %v512_v0  ;;  %368 = vmatpush3.bf16.msra.mxu1 %v402_v11 }
  0x3f   :  { %369 = vmatprep.subr.bf16.mxu1 %v512_v0  ;;  %p486_p13 = por %p485_p12, %p484_p11 }
  0x41   :  { %350 = vmatpush3.bf16.msra.mxu0 %v395_v3  ;;  %p487_p0 = pnand %p486_p13, %p480_p10 }
  0x42   :  { %351 = vmatprep.subr.bf16.mxu0 %v512_v0  ;;  %370 = vmatpush3.bf16.msra.mxu1 %v403_v12 }
  0x43   :  { %371 = vmatprep.subr.bf16.mxu1 %v512_v0 }
  0x45   :  { %352 = vmatpush3.bf16.msra.mxu0 %v396_v4 }
  0x46   :  { %353 = vmatprep.subr.bf16.mxu0 %v512_v0  ;;  %372 = vmatpush3.bf16.msra.mxu1 %v404_v13 }
  0x47   :  { %373 = vmatprep.subr.bf16.mxu1 %v512_v0 }
  0x49   :  { %354 = vmatpush3.bf16.msra.mxu0 %v397_v5 }
  0x4a   :  { %355 = vmatprep.subr.bf16.mxu0 %v512_v0  ;;  %374 = vmatpush3.bf16.msra.mxu1 %v405_v14 }
  0x4b   :  { %375 = vmatprep.subr.bf16.mxu1 %v512_v0 }
  0x4d   :  { %356 = vmatpush3.bf16.msra.mxu0 %v398_v6 }
  0x4e   :  { %357 = vmatprep.subr.bf16.mxu0 %v512_v0  ;;  %376 = vmatpush3.bf16.msra.mxu1 %v406_v15 }
  0x4f   :  { %377 = vmatprep.subr.bf16.mxu1 %v512_v0 }
  0x51   :  { %358 = vmatpush3.bf16.msra.mxu0 %v399_v7 }
  0x52   :  { %359 = vmatprep.subr.bf16.mxu0 %v512_v0  ;;  %378 = vmatpush3.bf16.msra.mxu1 %v407_v16 }
  0x53   :  { %379 = vmatprep.subr.bf16.mxu1 %v512_v0 }
  0x55   :  { %360 = vmatpush3.bf16.msra.mxu0 %v400_v8 }
  0x56   :  { %380 = vmatpush3.bf16.msra.mxu1 %v408_v17 }
  0x58   :  { %362 = vmatmul.mubr.bf16.vlgmr.msra.gmra.mrb[0].mxu0 %v61_v9 }
 0x12b   :  { %v167_v19 = vpop.f32.mrb[0].mxu0 }
 0x12c   :  { %v168_v20 = vadd.f32 %v308_v18, %v167_v19  ;;  %v363_v21 = vpop.f32.mrb[1].mxu0 }
 0x12d   :  { %v170_v22 = vpop.f32.mrb[2].mxu0 }
 0x12e   :  { %v317_v23 = vmul.f32 -1.442695, %v168_v20  ;;  %v364_v24 = vpop.f32.mrb[3].mxu0 }
 0x130   :  { %409 = vpow2.f32 %v317_v23 }
 0x13a   :  { %v410_v25 = vpop.eup %409 }
 0x13b   :  { %v176_v26 = vadd.f32 1.0, %v410_v25 }
 0x13d   :  { %411 = vrcp.f32 %v176_v26 }
 0x147   :  { %v412_v27 = vpop.eup %411 }
 0x148   :  { %v179_v28 = vpack.c.bf16 %v412_v27, %v412_v27 }
 0x14a   :  { %382 = vmatmul.mubr.bf16.vlgmr.msra.gmra.mrb[0].mxu1 %v179_v28 }
 0x21d   :  { %v285_v30 = vpop.f32.mrb[0].mxu1 }
 0x21e   :  { %v286_v31 = vadd.f32 %v318_v29, %v285_v30  ;;  %v383_v32 = vpop.f32.mrb[1].mxu1 }
 0x21f   :  { %v288_v33 = vpop.f32.mrb[2].mxu1 }
 0x220   :  { %291 = vst [vmem:[#allocation8] sm:$0xff] %v286_v31  ;;  %v384_v34 = vpop.f32.mrb[3].mxu1 }
 0x221   :  { %490 = shalt.err (!%p487_p0)
}
 0x222   :  { %s491_s4 = scalar_lea.hbm %s610_s5, 128 }
 0x223   :  { %p492_p1 = scmp.ne.s32.totalorder %s610_s5, %s491_s4  ;;  %p495_p2 = scmp.lt.u32.totalorder %s491_s4, %s610_s5 }
 0x225   :  { %p497_p3 = pnand %p495_p2, %p492_p1 }
 0x227   :  { %500 = shalt.err (!%p497_p3)
}
 0x228   :  { %301 = dma.vmem_to_hbm [thread:$0]  %s299_s8, 128, %s610_s5, [#allocation4]  }
 0x229   :  { %505 = dma.done.wait [#allocation4], 128  }
 0x22a   :  { %506 = vsyncadd [#allocation4], 4294967168 }
 0x22b   :  { %305 = vsyncpa [#allocation3], 1 }
 0x22c   :  { %306 = vsyncpa [#allocation6], 1 }
 0x22d   :  { %307 = vsyncpa [#allocation4], 1 }

</bundles_post_ra>
